<compile_context>
chip_gen: v7x
topology: tpu7x:2x2x1
jax: 0.10.0
libtpu: 0.0.40
codegen_flags: <defaults>
</compile_context>

<pallas_src>
import functools

import jax
import jax.numpy as jnp
from jax.experimental import pallas as pl
from jax.experimental.pallas import tpu as pltpu


def _focal_loss_kernel(prob_ref, tgt_ref, *rest, gamma, smooth, hw_total,
                       jps, apply_softmax, use_alpha, need_mask):
    """One (batch i, spatial split s, spatial tile j) grid step.

    prob_ref : (1, C, thw)   probabilities or logits; class on sublanes, spatial on lanes
    tgt_ref  : (1, 1, thw)   integer class ids
    alpha_ref: (C, 1)        per-class weights (only present when use_alpha)
    out_ref  : (1, 128)      per-(batch, split) reduced partial sum (lane 0)
    acc_ref  : (1, thw) f32  VMEM scratch, lane-dense running sum across j
    """
    if use_alpha:
        alpha_ref, out_ref, acc_ref = rest
    else:
        alpha_ref = None
        out_ref, acc_ref = rest

    s = pl.program_id(1)
    j = pl.program_id(2)

    @pl.when(j == 0)
    def _init():
        acc_ref[...] = jnp.zeros_like(acc_ref)
        out_ref[...] = jnp.zeros_like(out_ref)

    x = prob_ref[0].astype(jnp.float32)                  # (C, thw)
    tgt = tgt_ref[0].astype(jnp.int32)                   # (1, thw)
    num_class, thw = x.shape

    # Exact one-hot as a bool mask: class iota on sublanes vs target on lanes.
    cls_ids = jax.lax.broadcasted_iota(jnp.int32, (num_class, thw), 0)
    is_tgt = cls_ids == tgt                              # (C, thw) bool

    # Label smoothing: clamp(one_hot, smooth/(C-1), 1-smooth) == a select.
    low = (smooth / (num_class - 1)) if num_class > 1 else 0.0
    high = 1.0 - smooth
    one_hot_sm = jnp.where(is_tgt, jnp.float32(high), jnp.float32(low))

    if apply_softmax:
        # Fused softmax over C (sublanes): pt = sum(one_hot_sm * e) / sum(e) + smooth.
        m = jnp.max(x, axis=0, keepdims=True)            # (1, thw)
        e = jnp.exp(x - m)                               # (C, thw)  -> EUP
        denom = jnp.sum(e, axis=0, keepdims=True)        # (1, thw)
        numer = jnp.sum(one_hot_sm * e, axis=0, keepdims=True)
        pt = numer / denom + smooth
    else:
        pt = jnp.sum(one_hot_sm * x, axis=0, keepdims=True) + smooth

    logpt = jnp.log(pt)
    one_minus = 1.0 - pt
    gam = float(gamma)
    if gam == 2.0:            # module default: plain VALU muls, no pow chain
        focal = one_minus * one_minus
    elif gam == 1.0:
        focal = one_minus
    elif gam == 0.0:
        focal = jnp.ones_like(one_minus)
    else:
        # NOTE: mirrors PyTorch -- with label smoothing pt can slightly exceed
        # 1.0, so a non-integer gamma may produce NaN here, as in the reference.
        focal = jnp.power(one_minus, gam)

    loss = -(focal * logpt)                              # (1, thw)

    if use_alpha:
        alpha = alpha_ref[...].astype(jnp.float32)       # (C, 1)
        alpha_t = jnp.sum(jnp.where(is_tgt, alpha, 0.0), axis=0, keepdims=True)
        loss = alpha_t * loss

    if need_mask:
        g_tile = s * jps + j                             # intended (unclamped) tile id
        fully_valid = (g_tile + 1) * thw <= hw_total

        @pl.when(fully_valid)
        def _acc_fast():                                  # hot path: no iota/select
            acc_ref[...] = acc_ref[...] + loss

        @pl.when(jnp.logical_not(fully_valid))
        def _acc_masked():                                # boundary / OOB tiles only
            lane = jax.lax.broadcasted_iota(jnp.int32, loss.shape, 1)
            valid = (g_tile * thw + lane) < hw_total
            # True select: NaN/Inf from garbage lanes never reaches the accumulator.
            acc_ref[...] = acc_ref[...] + jnp.where(valid, loss, 0.0)
    else:
        acc_ref[...] = acc_ref[...] + loss

    @pl.when(j == jps - 1)
    def _finalize():
        total = jnp.sum(acc_ref[...])                    # one XLU reduce per (i, s)
        lane = jax.lax.broadcasted_iota(jnp.int32, out_ref.shape, 1)
        out_ref[...] = jnp.where(lane == 0, total, 0.0)


def focal_loss_pallas(logit, target, *, apply_nonlin=None, alpha=None, gamma=2,
                      balance_index=0, smooth=1e-05, size_average=True,
                      tile_hw=None, vmem_limit_bytes=48 * 1024 * 1024):
    """Forward pass of nnU-Net FocalLoss.

    logit : (N, C, *spatial). If apply_nonlin is None these are probabilities
            (exactly like the PyTorch module); if apply_nonlin == "softmax" they
            are raw logits and softmax over C is fused into the kernel.
            f32 or bf16 accepted.
    target: (N, 1, *spatial) or (N, *spatial) integer class ids (any int dtype).
    Returns a scalar float32 loss (mean if size_average else sum).
    """
    if apply_nonlin not in (None, "softmax"):
        raise ValueError("apply_nonlin must be None or 'softmax'")
    if smooth is not None and (smooth < 0 or smooth > 1.0):
        raise ValueError('smooth value should be in [0,1]')
    smooth = 0.0 if smooth is None else float(smooth)

    n, c = logit.shape[:2]
    hw = 1
    for d in logit.shape[2:]:
        hw *= d

    # Free reshapes only (memory order preserved) -- no transpose HBM pass.
    x3 = logit.reshape(n, c, hw)
    tgt = jnp.reshape(target, (n, 1, hw))
    if not jnp.issubdtype(tgt.dtype, jnp.integer):
        tgt = tgt.astype(jnp.int32)

    # alpha -> (C, 1) column, mirroring the module's __init__/forward semantics.
    if alpha is None:
        use_alpha = False
        alpha_col = None
    elif isinstance(alpha, float):
        alpha_col = jnp.full((c, 1), 1.0 - alpha, jnp.float32)
        alpha_col = alpha_col.at[balance_index, 0].set(alpha)
        use_alpha = True
    elif isinstance(alpha, (list, tuple)) or hasattr(alpha, "shape"):
        a = jnp.asarray(alpha, jnp.float32).reshape(c, 1)
        alpha_col = a / jnp.sum(a)
        use_alpha = True
    else:
        raise TypeError('Not support alpha type')

    # Tile sizing: aim for ~4 MiB probs block in VMEM (C pads to 8 sublanes),
    # cap at 131072 lanes so the step budget stays inside v7x's 64 MiB VMEM.
    if tile_hw is None:
        c_pad = ((c + 7) // 8) * 8
        tile_hw = (4 * 1024 * 1024) // (c_pad * 4)
        tile_hw = max(128, min(131072, (tile_hw // 128) * 128))
    assert tile_hw % 128 == 0, "tile_hw must be a multiple of 128 lanes"

    thw = hw if hw <= tile_hw else tile_hw               # lane-dense spatial block
    num_j = -(-hw // thw)                                # total spatial tiles
    n_split = 2 if num_j >= 2 else 1                     # v7x: both TCs busy at N==1
    jps = -(-num_j // n_split)                           # tiles per split
    need_clamp = n_split * jps > num_j                   # split 1 may run off the end
    need_mask = n_split * jps * thw != hw                # ragged tail or OOB tiles

    if need_clamp:
        def spatial_block(s, j):
            return jnp.minimum(s * jps + j, num_j - 1)   # re-read last tile, masked to 0
    else:
        def spatial_block(s, j):
            return s * jps + j

    in_specs = [
        pl.BlockSpec((1, c, thw), lambda i, s, j: (i, 0, spatial_block(s, j))),
        pl.BlockSpec((1, 1, thw), lambda i, s, j: (i, 0, spatial_block(s, j))),
    ]
    args = [x3, tgt]
    if use_alpha:
        in_specs.append(pl.BlockSpec((c, 1), lambda i, s, j: (0, 0)))
        args.append(alpha_col)

    kernel = functools.partial(
        _focal_loss_kernel, gamma=float(gamma), smooth=smooth, hw_total=hw,
        jps=jps, apply_softmax=(apply_nonlin == "softmax"),
        use_alpha=use_alpha, need_mask=need_mask)

    partials = pl.pallas_call(
        kernel,
        out_shape=jax.ShapeDtypeStruct((1, n * n_split * 128), jnp.float32),
        grid_spec=pltpu.PrefetchScalarGridSpec(
            num_scalar_prefetch=0,
            grid=(n, n_split, jps),
            in_specs=in_specs,
            out_specs=pl.BlockSpec((1, 128), lambda i, s, j: (0, i * n_split + s)),
            scratch_shapes=[pltpu.VMEM((1, thw), jnp.float32)],
        ),
        compiler_params=pltpu.CompilerParams(
            dimension_semantics=("parallel", "parallel", "arbitrary"),
            vmem_limit_bytes=vmem_limit_bytes),
    )(*args)

    total = jnp.sum(partials)
    if size_average:
        return total / jnp.float32(n * hw)
    return total


def _focal_loss_ref(probs_nchw, target, *, alpha=None, gamma=2.0, smooth=1e-05,
                    balance_index=0, size_average=True):
    """Pure-JAX reference matching the PyTorch forward (expects probabilities)."""
    n, c = probs_nchw.shape[:2]
    probs = probs_nchw.reshape(n, c, -1)
    probs = jnp.transpose(probs, (0, 2, 1)).reshape(-1, c).astype(jnp.float32)
    tgt = jnp.reshape(target, (-1,)).astype(jnp.int32)
    one_hot = jax.nn.one_hot(tgt, c, dtype=jnp.float32)
    if smooth:
        one_hot = jnp.clip(one_hot, smooth / (c - 1), 1.0 - smooth)
    pt = jnp.sum(one_hot * probs, axis=1) + smooth
    logpt = jnp.log(pt)
    if alpha is None:
        alpha_t = jnp.ones_like(pt)
    elif isinstance(alpha, (list, tuple)):
        a = jnp.asarray(alpha, jnp.float32)
        a = a / jnp.sum(a)
        alpha_t = a[tgt]
    else:
        a = jnp.full((c,), 1.0 - alpha, jnp.float32).at[balance_index].set(alpha)
        alpha_t = a[tgt]
    loss = -alpha_t * jnp.power(1.0 - pt, gamma) * logpt
    return jnp.mean(loss) if size_average else jnp.sum(loss)


if __name__ == "__main__":
    key = jax.random.PRNGKey(0)
    k1, k2, k3, k4, k5, k6 = jax.random.split(key, 6)

    # --- Test 1: module defaults + FUSED softmax (apply_nonlin="softmax") ----
    N, C, H, W = 2, 4, 16, 16
    logits = jax.random.normal(k1, (N, C, H, W), jnp.float32)
    target = jax.random.randint(k2, (N, 1, H, W), 0, C, jnp.int32)

    loss = focal_loss_pallas(logits, target, apply_nonlin="softmax",
                             alpha=None, gamma=2, smooth=1e-05, size_average=True)
    jax.block_until_ready(loss)
    ref = _focal_loss_ref(jax.nn.softmax(logits, axis=1), target,
                          alpha=None, gamma=2, smooth=1e-05)
    assert jnp.allclose(loss, ref, rtol=1e-5, atol=1e-6), (loss, ref)

    # --- Test 2: probabilities path, class-weight alpha, ragged spatial tail --
    N2, C2, H2, W2 = 2, 4, 10, 20                  # HW=200, tile_hw=128 -> ragged mask
    probs2 = jax.nn.softmax(jax.random.normal(k3, (N2, C2, H2, W2), jnp.float32), axis=1)
    target2 = jax.random.randint(k4, (N2, 1, H2, W2), 0, C2, jnp.int32)
    alpha2 = [1.0, 2.0, 3.0, 4.0]

    loss2 = focal_loss_pallas(probs2, target2, apply_nonlin=None, alpha=alpha2,
                              gamma=2, smooth=1e-05, size_average=True, tile_hw=128)
    jax.block_until_ready(loss2)
    ref2 = _focal_loss_ref(probs2, target2, alpha=alpha2, gamma=2, smooth=1e-05)
    assert jnp.allclose(loss2, ref2, rtol=1e-5, atol=1e-6), (loss2, ref2)

    # --- Test 3: N=1 (split axis), bf16 probs, float alpha, odd tile count,
    #             (N,*spatial) target form, size_average=False ----------------
    N3, C3, H3, W3 = 1, 4, 12, 32                  # HW=384, tile_hw=128 -> 3 tiles, split=2
    probs3 = jax.nn.softmax(jax.random.normal(k5, (N3, C3, H3, W3), jnp.float32),
                            axis=1).astype(jnp.bfloat16)
    target3 = jax.random.randint(k6, (N3, H3, W3), 0, C3, jnp.int32)

    loss3 = focal_loss_pallas(probs3, target3, apply_nonlin=None, alpha=0.25,
                              balance_index=1, gamma=2, smooth=1e-05,
                              size_average=False, tile_hw=128)
    jax.block_until_ready(loss3)
    ref3 = _focal_loss_ref(probs3.astype(jnp.float32), target3, alpha=0.25,
                           balance_index=1, gamma=2, smooth=1e-05, size_average=False)
    assert jnp.allclose(loss3, ref3, rtol=1e-5, atol=1e-4), (loss3, ref3)

    print("KERNEL_OK")
</pallas_src>

<mosaic_0001>
module attributes {stable_mosaic.version = 11 : i64} {
  func.func @_focal_loss_kernel(%arg0: i32, %arg1: i32, %arg2: i32, %arg3: memref<1x4x256xf32, #tpu.memory_space<vmem>>, %arg4: memref<1x1x256xi32, #tpu.memory_space<vmem>>, %arg5: memref<1x128xf32, #tpu.memory_space<vmem>>, %arg6: memref<1x256xf32, #tpu.memory_space<vmem>>) attributes {dimension_semantics = [#tpu.dimension_semantics<parallel>, #tpu.dimension_semantics<parallel>, #tpu.dimension_semantics<arbitrary>], iteration_bounds = array<i64: 2, 1, 1>, scalar_prefetch = 0 : i64, scratch_operands = 1 : i64, tpu.core_type = #tpu.core_type<tc>, window_params = [{transform_indices = @transform_0, window_bounds = array<i64: 1, 4, 256>}, {transform_indices = @transform_1, window_bounds = array<i64: 1, 1, 256>}, {transform_indices = @transform_2, window_bounds = array<i64: 1, 128>}]} {
    %c0_i32 = arith.constant 0 : i32
    %0 = arith.cmpi eq, %arg2, %c0_i32 : i32
    %1 = arith.extui %0 : i1 to i32
    %c0_i32_0 = arith.constant 0 : i32
    %2 = arith.cmpi ne, %1, %c0_i32_0 : i32
    scf.if %2 {
      %cst_19 = arith.constant 0.000000e+00 : f32
      %39 = vector.broadcast %cst_19 : f32 to vector<1x256xf32>
      %c0_20 = arith.constant 0 : index
      %c0_21 = arith.constant 0 : index
      %40 = vector.load %arg6[%c0_20, %c0_21] : memref<1x256xf32, #tpu.memory_space<vmem>>, vector<1x256xf32>
      tpu.vector_store %arg6[%c0_20, %c0_21], %39 {strides = array<i32>} : memref<1x256xf32, #tpu.memory_space<vmem>>, vector<1x256xf32>,
      %cst_22 = arith.constant 0.000000e+00 : f32
      %41 = vector.broadcast %cst_22 : f32 to vector<1x128xf32>
      %c0_23 = arith.constant 0 : index
      %c0_24 = arith.constant 0 : index
      %42 = vector.load %arg5[%c0_23, %c0_24] : memref<1x128xf32, #tpu.memory_space<vmem>>, vector<1x128xf32>
      tpu.vector_store %arg5[%c0_23, %c0_24], %41 {strides = array<i32>} : memref<1x128xf32, #tpu.memory_space<vmem>>, vector<1x128xf32>,
    } else {
    }
    %c0 = arith.constant 0 : index
    %c0_1 = arith.constant 0 : index
    %c0_2 = arith.constant 0 : index
    %3 = vector.load %arg3[%c0, %c0_1, %c0_2] : memref<1x4x256xf32, #tpu.memory_space<vmem>>, vector<1x4x256xf32>
    %4 = vector.shape_cast %3 : vector<1x4x256xf32> to vector<4x256xf32>
    %c0_3 = arith.constant 0 : index
    %c0_4 = arith.constant 0 : index
    %c0_5 = arith.constant 0 : index
    %5 = vector.load %arg4[%c0_3, %c0_4, %c0_5] : memref<1x1x256xi32, #tpu.memory_space<vmem>>, vector<1x1x256xi32>
    %6 = vector.shape_cast %5 : vector<1x1x256xi32> to vector<1x256xi32>
    %7 = tpu.iota {dimensions = array<i32: 0>} : vector<4x256xi32>
    %8 = vector.broadcast %6 : vector<1x256xi32> to vector<4x256xi32>
    %9 = arith.cmpi eq, %7, %8 : vector<4x256xi32>
    %cst = arith.constant 0.999989986 : f32
    %cst_6 = arith.constant 3.33333332E-6 : f32
    %10 = vector.broadcast %cst : f32 to vector<4x256xf32>
    %11 = vector.broadcast %cst_6 : f32 to vector<4x256xf32>
    %12 = arith.select %9, %10, %11 : vector<4x256xi1>, vector<4x256xf32>
    %cst_7 = arith.constant dense<0xFF800000> : vector<256xf32>
    %13 = vector.multi_reduction <maximumf>, %4, %cst_7 [0] : vector<4x256xf32> to vector<256xf32>
    %14 = vector.shape_cast %13 : vector<256xf32> to vector<1x256xf32>
    %15 = vector.broadcast %14 : vector<1x256xf32> to vector<4x256xf32>
    %16 = arith.subf %4, %15 : vector<4x256xf32>
    %17 = math.exp %16 : vector<4x256xf32>
    %cst_8 = arith.constant dense<0.000000e+00> : vector<256xf32>
    %18 = vector.multi_reduction <add>, %17, %cst_8 [0] : vector<4x256xf32> to vector<256xf32>
    %19 = vector.shape_cast %18 : vector<256xf32> to vector<1x256xf32>
    %20 = arith.mulf %12, %17 : vector<4x256xf32>
    %cst_9 = arith.constant dense<0.000000e+00> : vector<256xf32>
    %21 = vector.multi_reduction <add>, %20, %cst_9 [0] : vector<4x256xf32> to vector<256xf32>
    %22 = vector.shape_cast %21 : vector<256xf32> to vector<1x256xf32>
    %23 = arith.divf %22, %19 : vector<1x256xf32>
    %cst_10 = arith.constant 9.99999974E-6 : f32
    %24 = vector.broadcast %cst_10 : f32 to vector<1x256xf32>
    %25 = arith.addf %23, %24 : vector<1x256xf32>
    %26 = math.log %25 : vector<1x256xf32>
    %cst_11 = arith.constant 1.000000e+00 : f32
    %27 = vector.broadcast %cst_11 : f32 to vector<1x256xf32>
    %28 = arith.subf %27, %25 : vector<1x256xf32>
    %29 = arith.mulf %28, %28 : vector<1x256xf32>
    %30 = arith.mulf %29, %26 : vector<1x256xf32>
    %cst_12 = arith.constant 0.000000e+00 : f32
    %31 = vector.broadcast %cst_12 : f32 to vector<1x256xf32>
    %32 = arith.subf %31, %30 : vector<1x256xf32>
    %c0_13 = arith.constant 0 : index
    %c0_14 = arith.constant 0 : index
    %33 = vector.load %arg6[%c0_13, %c0_14] : memref<1x256xf32, #tpu.memory_space<vmem>>, vector<1x256xf32>
    %34 = arith.addf %33, %32 : vector<1x256xf32>
    %c0_15 = arith.constant 0 : index
    %c0_16 = arith.constant 0 : index
    %35 = vector.load %arg6[%c0_15, %c0_16] : memref<1x256xf32, #tpu.memory_space<vmem>>, vector<1x256xf32>
    tpu.vector_store %arg6[%c0_15, %c0_16], %34 {strides = array<i32>} : memref<1x256xf32, #tpu.memory_space<vmem>>, vector<1x256xf32>,
    %c0_i32_17 = arith.constant 0 : i32
    %36 = arith.cmpi eq, %arg2, %c0_i32_17 : i32
    %37 = arith.extui %36 : i1 to i32
    %c0_i32_18 = arith.constant 0 : i32
    %38 = arith.cmpi ne, %37, %c0_i32_18 : i32
    scf.if %38 {
      %c0_19 = arith.constant 0 : index
      %c0_20 = arith.constant 0 : index
      %39 = vector.load %arg6[%c0_19, %c0_20] : memref<1x256xf32, #tpu.memory_space<vmem>>, vector<1x256xf32>
      %40 = vector.shape_cast %39 : vector<1x256xf32> to vector<1x1x256xf32>
      %cst_21 = arith.constant dense<0.000000e+00> : vector<1xf32>
      %41 = vector.multi_reduction <add>, %40, %cst_21 [1, 2] : vector<1x1x256xf32> to vector<1xf32>
      %42 = vector.shape_cast %41 : vector<1xf32> to vector<1x1x1xf32>
      %43 = vector.extract %42[0, 0, 0] : f32 from vector<1x1x1xf32>
      %44 = tpu.iota {dimensions = array<i32: 1>} : vector<1x128xi32>
      %c0_i32_22 = arith.constant 0 : i32
      %45 = vector.broadcast %c0_i32_22 : i32 to vector<1x128xi32>
      %46 = arith.cmpi eq, %44, %45 : vector<1x128xi32>
      %cst_23 = arith.constant 0.000000e+00 : f32
      %47 = vector.broadcast %43 : f32 to vector<1x128xf32>
      %48 = vector.broadcast %cst_23 : f32 to vector<1x128xf32>
      %49 = arith.select %46, %47, %48 : vector<1x128xi1>, vector<1x128xf32>
      %c0_24 = arith.constant 0 : index
      %c0_25 = arith.constant 0 : index
      %50 = vector.load %arg5[%c0_24, %c0_25] : memref<1x128xf32, #tpu.memory_space<vmem>>, vector<1x128xf32>
      tpu.vector_store %arg5[%c0_24, %c0_25], %49 {strides = array<i32>} : memref<1x128xf32, #tpu.memory_space<vmem>>, vector<1x128xf32>,
    } else {
    }
    return
  }
  func.func @transform_0(%arg0: i32, %arg1: i32, %arg2: i32) -> (i32, i32, i32) {
    %c1_i32 = arith.constant 1 : i32
    %0 = arith.muli %arg1, %c1_i32 : i32
    %1 = arith.addi %0, %arg2 : i32
    %c0_i32 = arith.constant 0 : i32
    %c0_i32_0 = arith.constant 0 : i32
    return %arg0, %c0_i32, %1 : i32, i32, i32
  }
  func.func @transform_1(%arg0: i32, %arg1: i32, %arg2: i32) -> (i32, i32, i32) {
    %c1_i32 = arith.constant 1 : i32
    %0 = arith.muli %arg1, %c1_i32 : i32
    %1 = arith.addi %0, %arg2 : i32
    %c0_i32 = arith.constant 0 : i32
    %c0_i32_0 = arith.constant 0 : i32
    return %arg0, %c0_i32, %1 : i32, i32, i32
  }
  func.func @transform_2(%arg0: i32, %arg1: i32, %arg2: i32) -> (i32, i32) {
    %c1_i32 = arith.constant 1 : i32
    %0 = arith.muli %arg0, %c1_i32 : i32
    %1 = arith.addi %0, %arg1 : i32
    %c0_i32 = arith.constant 0 : i32
    %c0_i32_0 = arith.constant 0 : i32
    return %c0_i32, %1 : i32, i32
  }
}

</mosaic_0001>

<bundles_post_ra>
// kernel: tpu_custom_call.1
= control target key start
LH: loop header
LB: loop body
LE: loop exit
PB: predicated region body
PF: predicated region fallthrough
CT: control target
= control target key end

     0   :  { %7 = vsyncpa [#allocation4], 0  ;;  %s1041_s0 = inlined_call_operand.hbm [shape: f32[2,4,256], index: 0, kind: input, shape index: {}]   ;;  %s1042_s1 = inlined_call_operand.hbm [shape: s32[2,1,256], index: 1, kind: input, shape index: {}]   ;;  %s1043_s2 = inlined_call_operand.hbm [shape: f32[1,256], index: 2, kind: output, shape index: {}]  }
   0x1   :  { %9 = vsyncpa [#allocation4 + $0x1], 0 }
   0x2   :  { %10 = vsyncpa [#allocation7], 0 }
   0x3   :  { %12 = vsyncpa [#allocation7 + $0x1], 0 }
   0x4   :  { %13 = vsyncpa [#allocation5], 0 }
   0x5   :  { %15 = vsyncpa [#allocation5 + $0x1], 0  ;;  %s791_s9 = smov 0   ;;  %s793_s10 = smov 0  }
   0x6   :  { %s795_s11 = smov 0   ;;  %s797_s12 = smov 0  }
   0x7   :  { %s799_s13 = smov 0   ;;  %s801_s14 = smov 0  }
   0x8 LB: > { %s521_s15 = sadd.s32 4294967295, %s768_s14   ;;  %s522_s16 = sadd.s32 4294967294, %s768_s14   ;;  %s768_s14 = sphi %s801_s14, %s21_s14   ;;  %s764_s13 = sphi %s799_s13, %s1065_s13   ;;  %s760_s12 = sphi %s797_s12, %s1064_s12   ;;  %s756_s11 = sphi %s795_s11, %s1063_s11   ;;  %s752_s10 = sphi %s793_s10, %s1062_s10   ;;  %s748_s9 = sphi %s791_s9, %s1061_s9  }
   0x9   : > { %s40_s17 = sadd.s32 1, %s764_s13  ;;  %s51_s18 = sadd.s32 1, %s756_s11 }
   0xa   : > { %p42_p0 = scmp.ge.s32.totalorder %s40_s17, 2  ;;  %p58_p1 = scmp.ne.s32.totalorder %s756_s11, %s752_s10 }
   0xb   : > { %p59_p2 = scmp.eq.s32.totalorder %s768_s14, 0  ;;  %p64_p3 = scmp.ne.s32.totalorder %s752_s10, %s748_s9 }
   0xc   : > { %s1067_s17 = smov (%p42_p0, %s40_s17), 0  ;;  %p65_p5 = scmp.eq.s32.totalorder %s521_s15, 0 }
   0xd   : > { %p832_p4 = por %p59_p2, %p58_p1  ;;  %s46_s20 = ssub.s32 %s764_s13, %s1067_s17 }
   0xe   : > { %p120_p6 = scmp.eq.s32.totalorder %s521_s15, 1  ;;  %p49_p7 = scmp.eq.s32.totalorder %s46_s20, 0 }
   0xf   : > { %p838_p8 = por %p65_p5, %p64_p3  ;;  %p126_p10 = scmp.eq.s32.totalorder %s522_s16, 1 }
  0x10   : > { %p842_p9 = por %p120_p6, %p58_p1  ;;  %p558_p13 = scmp.lt.s32.totalorder %s768_s14, 2 }
  0x11   : > { %s1047_s21 = scalar_select %p838_p8, 1, 0 }
  0x12   : > { %s1048_s22 = scalar_select %p842_p9, 1, 0 }
  0x13   : > { %s847_s23 = scalar_select %p49_p7, %s756_s11, %s51_s18  }
  0x14   : > { %p849_p11 = por %p126_p10, %p64_p3  ;;  %s856_s25 = sand.u32 1, %s756_s11  }
  0x15   : > { %s525_s26 = sshll.u32 %s856_s25, 3  ;;  %s537_s27 = sshll.u32 %s764_s13, 7 }
  0x16   : > { %s1049_s24 = scalar_select %p849_p11, 1, 0 }
  0x17   : > { %s863_s30 = scalar_lea.hbm %s1041_s0, %s537_s27  ;;  %s150_s3 = scalar_lea.vmem [#allocation3], %s525_s26 }
  0x18   : > { %s161_s4 = sshll.u32 %s150_s3, 4  ;;  %p869_p0 = pnand %p558_p13, %p832_p4  ;;  %s865_s4 = int_to_ptr.vmem [resolvable:$true] %s161_s4 }
  0x19   : > { %s147_s6 = scalar_lea.sflag [#allocation4], %s856_s25  ;;  %s622_s7 = scalar_lea.hbm %s863_s30, 128 }
  0x1a   : > { %p623_p3 = scmp.ne.s32.totalorder %s863_s30, %s622_s7  ;;  %p624_p5 = pneg %p869_p0 }
  0x1b   : > { %s627_s16 = scalar_lea.hbm %s1041_s0, 256  ;;  %p628_p4 = scmp.lt.u32.totalorder %s863_s30, %s1041_s0 }
  0x1c   : > { %p625_p6 = pnand %p624_p5, %p623_p3  ;;  %p629_p10 = scmp.lt.u32.totalorder %s627_s16, %s622_s7 }
  0x1d   : > { %p631_p12 = scmp.lt.u32.totalorder %s622_s7, %s863_s30 }
  0x1e   : > { %p626_p7 = pneg %p625_p6  ;;  %p630_p13 = por %p629_p10, %p628_p4 }
  0x20   : > { %p632_p1 = por %p631_p12, %p630_p13 }
  0x22   : > { %p633_p2 = pnand %p632_p1, %p626_p7 }
  0x24   : > { %636 = shalt.err (!%p633_p2)
}
  0x25   : > { %s637_s20 = scalar_lea.vmem %s865_s4, 128  ;;  %s770_s26 = smov [#allocation3]  }
  0x26   : > { %p638_p3 = scmp.ne.s32.totalorder %s865_s4, %s637_s20  ;;  %s642_s27 = sshll.u32 %s770_s26, 4  ;;  %s643_s27 = int_to_ptr.vmem [resolvable:$false] %s642_s27 }
  0x27   : > { %s644_s28 = scalar_lea.vmem %s643_s27, 256  ;;  %p645_p9 = scmp.lt.s32.totalorder %s865_s4, %s643_s27 }
  0x28   : > { %p640_p6 = pnand %p638_p3, %p624_p5  ;;  %p646_p4 = scmp.lt.s32.totalorder %s644_s28, %s637_s20 }
  0x2a   : > { %p641_p11 = pneg %p640_p6  ;;  %p647_p10 = por %p646_p4, %p645_p9 }
  0x2c   : > { %p648_p12 = pnand %p647_p10, %p641_p11 }
  0x2e   : > { %651 = shalt.err (!%p648_p12)
}
  0x2f   : > { %550 = dma.hbm_to_vmem [thread:$0]  (!%p869_p0), %s863_s30, 128, %s865_s4, %s147_s6  }
  0x30   : > { %p1051_p1 = scmp.lt.s32.totalorder %s768_s14, 3  ;;  %p1052_p2 = scmp.ge.s32.totalorder %s768_s14, 1 }
  0x31   : > { %s528_s3 = sshll.u32 %s856_s25, 1  ;;  %s538_s7 = sshll.u32 %s764_s13, 5 }
  0x32   : > { %p905_p7 = pnand %p1052_p2, %p1051_p1  ;;  %s914_s16 = scalar_lea.hbm %s1042_s1, %s538_s7 }
  0x33   : > { %s172_s18 = scalar_lea.vmem [#allocation6], %s528_s3  ;;  %s169_s30 = scalar_lea.sflag [#allocation7], %s856_s25 }
  0x34   : > { %s1053_s29 = scalar_select %p905_p7, 1, 0 }
  0x35   : > { %s183_s19 = sshll.u32 %s172_s18, 4  ;;  %s652_s4 = scalar_lea.hbm %s914_s16, 32  ;;  %s184_s19 = int_to_ptr.vmem [resolvable:$true] %s183_s19 }
  0x36   : > { %p653_p9 = scmp.ne.s32.totalorder %s914_s16, %s652_s4  ;;  %s657_s26 = scalar_lea.hbm %s1042_s1, 64 }
  0x37   : > { %p658_p3 = scmp.lt.u32.totalorder %s914_s16, %s1042_s1  ;;  %p659_p6 = scmp.lt.u32.totalorder %s657_s26, %s652_s4 }
  0x38   : > { %p655_p11 = pnand %p653_p9, %p624_p5  ;;  %p661_p10 = scmp.lt.u32.totalorder %s652_s4, %s914_s16 }
  0x39   : > { %p660_p4 = por %p659_p6, %p658_p3 }
  0x3a   : > { %p656_p13 = pneg %p655_p11 }
  0x3b   : > { %p662_p12 = por %p661_p10, %p660_p4 }
  0x3d   : > { %p663_p1 = pnand %p662_p12, %p656_p13 }
  0x3f   : > { %666 = shalt.err (!%p663_p1)
}
  0x40   : > { %s667_s25 = scalar_lea.vmem %s184_s19, 32  ;;  %s771_s3 = smov [#allocation6]  }
  0x41   : > { %p668_p2 = scmp.ne.s32.totalorder %s184_s19, %s667_s25  ;;  %s672_s7 = sshll.u32 %s771_s3, 4  ;;  %s673_s7 = int_to_ptr.vmem [resolvable:$false] %s672_s7 }
  0x42   : > { %s674_s8 = scalar_lea.vmem %s673_s7, 64  ;;  %p675_p8 = scmp.lt.s32.totalorder %s184_s19, %s673_s7 }
  0x43   : > { %p670_p9 = pnand %p668_p2, %p624_p5  ;;  %p676_p7 = scmp.lt.s32.totalorder %s674_s8, %s667_s25 }
  0x45   : > { %p671_p11 = pneg %p670_p9  ;;  %p677_p3 = por %p676_p7, %p675_p8 }
  0x47   : > { %p678_p6 = pnand %p677_p3, %p671_p11 }
  0x49   : > { %681 = shalt.err (!%p678_p6)
}
  0x4a   : > { %553 = dma.hbm_to_vmem [thread:$0]  (!%p869_p0), %s914_s16, 32, %s184_s19, %s169_s30  }
  0x4b   : > { %p1054_p13 = scmp.ne.s32.totalorder %s1053_s29, 0 }
  0x4c   : > { %s939_s15 = sand.u32 (!%p1054_p13), 1, %s752_s10   ;;  %p1055_p5 = scmp.ne.s32.totalorder (!%p1054_p13), %s1047_s21, 0 }
  0x4d   : > { %192 = sbr.rel (%p1054_p13) target bundleno = 409 (0x199), region = 28  ;;  %s532_s18 = sshll.u32 (!%p1054_p13), %s939_s15, 3 }
  0x4e   : > { %s195_s4 = scalar_lea.sflag (!%p1054_p13), [#allocation4], %s939_s15  ;;  %s198_s6 = scalar_lea.vmem (!%p1054_p13), [#allocation3], %s532_s18 }
  0x54   : > { %735 = dma.done.wait (%p1055_p5), %s195_s4, 128  }
  0x55   : > { %737 = vsyncadd (%p1055_p5), %s195_s4, 4294967168  ;;  %s533_s5 = sshll.u32 %s939_s15, 1  ;;  %s204_s29 = scalar_lea.sflag [#allocation7], %s939_s15 }
  0x56   : > { %s207_s16 = scalar_lea.vmem [#allocation6], %s533_s5 }
  0x57   : > { %739 = dma.done.wait (%p1055_p5), %s204_s29, 32  }
  0x58   : > { %741 = vsyncadd (%p1055_p5), %s204_s29, 4294967264  ;;  %v241_v0 = vlaneseq  ;;  %v772_v2 = vmov 0.0   ;;  %vm266_vm1 = vcmask 1043456   ;;  %v247_v3 = vld [vmem:[%s198_s6] sm:$0xff]  ;;  %v248_v23 = vld [vmem:[%s207_s16] sm:$0x3] }
  0x59   : > { %v264_v4 = vcombine.high %v247_v3, %v247_v3  ;;  %v267_v5 = vsel %vm266_vm1, %v247_v3, -inf  ;;  %v773_v28 = vmov 3.3333333e-06   ;;  %vm379_vm4 = vcmask 1040384   ;;  %s231_s21 = scalar_lea.vmem [#allocation8], %s939_s15  ;;  %s534_s19 = sshll.u32 %s760_s12, 4 }
  0x5a   : > { %vm954_vm0 = vcmp.lt.s32.totalorder %v241_v0, 256  ;;  %v268_v6 = vrot.slane %v267_v5, 4  ;;  %v964_v19 = vshrl.u32 %v241_v0, 7  ;;  %246 = vst [vmem:[%s231_s21] sm:$0x1] %v772_v2  ;;  %s412_s30 = sshll.u32 %s231_s21, 4  ;;  %s992_s28 = scalar_lea.hbm %s1043_s2, %s534_s19  ;;  %s994_s30 = int_to_ptr.vmem [resolvable:$true] %s412_s30 }
  0x5b   : > { %245 = vst.msk [vmem:[#allocation2] sm:$0x3] %vm954_vm0, %v772_v2  ;;  %v274_v7 = vsel %vm266_vm1, %v264_v4, -inf  ;;  %s399_s25 = scalar_lea.sflag [#allocation5], %s939_s15  ;;  %s682_s3 = scalar_lea.vmem %s994_s30, 16 }
  0x5c   : > { %v269_v8 = vmax.f32 %v267_v5, %v268_v6  ;;  %v275_v9 = vrot.slane %v274_v7, 4  ;;  %v253_v22 = vsub.s32 0, %v964_v19  ;;  %v257_v25 = vsub.s32 1, %v964_v19  ;;  %p683_p8 = scmp.ne.s32.totalorder %s994_s30, %s682_s3  ;;  %p1058_p0 = scmp.ne.s32.totalorder %s1048_s22, 0 }
  0x5d   : > { %s775_s12 = smov [#allocation8]  }
  0x5e   : > { %v270_v10 = vrot.slane %v269_v8, 2  ;;  %v276_v11 = vmax.f32 %v274_v7, %v275_v9  ;;  %v254_v26 = vrot.slane %v248_v23, %v253_v22  ;;  %v258_v27 = vrot.slane %v248_v23, %v257_v25  ;;  %p684_p7 = pnand %p683_p8, %p1058_p0  ;;  %s686_s7 = sshll.u32 %s775_s12, 4  ;;  %s687_s7 = int_to_ptr.vmem [resolvable:$false] %s686_s7 }
  0x5f   : > { %s688_s8 = scalar_lea.vmem %s687_s7, 32  ;;  %p689_p10 = scmp.lt.s32.totalorder %s994_s30, %s687_s7 }
  0x60   : > { %v271_v12 = vmax.f32 %v269_v8, %v270_v10  ;;  %v277_v13 = vrot.slane %v276_v11, 2  ;;  %vm259_vm2 = vcmp.eq.s32.totalorder %v964_v19, %v254_v26  ;;  %vm260_vm3 = vcmp.eq.s32.totalorder %v964_v19, %v258_v27  ;;  %p685_p4 = pneg %p684_p7  ;;  %p690_p12 = scmp.lt.s32.totalorder %s688_s8, %s682_s3 }
  0x61   : > { %v261_v29 = vsel %vm259_vm2, 0.99999, %v773_v28  ;;  %v262_v31 = vsel %vm260_vm3, 0.99999, %v773_v28 }
  0x62   : > { %v272_v14 = vrot.slane %v271_v12, 1  ;;  %v278_v15 = vmax.f32 %v276_v11, %v277_v13  ;;  %v774_v11 = vmov 1966171168   ;;  %p691_p1 = por %p690_p12, %p689_p10 }
  0x64   : > { %v273_v16 = vmax.f32 %v271_v12, %v272_v14  ;;  %v279_v17 = vrot.slane %v278_v15, 1  ;;  %v344_v12 = vunpack.c.l.s4 %v774_v11  ;;  %p692_p2 = pnand %p691_p1, %p685_p4 }
  0x66   : > { %v280_v18 = vmax.f32 %v278_v15, %v279_v17 }
  0x68   : > { %v283_v20 = vcombine.low %v273_v16, %v280_v18 }
  0x6a   : > { %v285_v21 = vsub.f32 %v247_v3, %v283_v20  ;;  %v345_v20 = vunpack.c.0.s8 %v344_v12 }
  0x6c   : > { %v286_v24 = vmul.f32 1.442695, %v285_v21  ;;  %v348_v26 = vsub.s32 %v345_v20, %v964_v19  ;;  %v393_v19 = vand.u32 127, %v241_v0 }
  0x6e   : > { %612 = vpow2.f32 %v286_v24  ;;  %vm394_vm5 = vcmp.eq.s32.totalorder %v393_v19, 0 }
  0x78   : > { %v613_v30 = vpop.eup %612 }
  0x79   : > { %v289_v32 = vcombine.high %v613_v30, %v613_v30  ;;  %v291_v33 = vsel %vm266_vm1, %v613_v30, 0.0  ;;  %v305_v34 = vmul.f32 %v613_v30, %v261_v29  ;;  %v339_v29 = vld [vmem:[#allocation2] sm:$0x3] }
  0x7a   : > { %v292_v35 = vrot.slane %v291_v33, 4 }
  0x7b   : > { %v298_v36 = vsel %vm266_vm1, %v289_v32, 0.0  ;;  %v306_v37 = vmul.f32 %v289_v32, %v262_v31  ;;  %v307_v38 = vsel %vm266_vm1, %v305_v34, 0.0 }
  0x7c   : > { %v293_v39 = vadd.f32 %v292_v35, %v291_v33  ;;  %v299_v40 = vrot.slane %v298_v36, 4  ;;  %v308_v41 = vrot.slane %v307_v38, 4 }
  0x7d   : > { %v314_v42 = vsel %vm266_vm1, %v306_v37, 0.0 }
  0x7e   : > { %v294_v43 = vrot.slane %v293_v39, 2  ;;  %v300_v44 = vadd.f32 %v299_v40, %v298_v36  ;;  %v309_v45 = vadd.f32 %v308_v41, %v307_v38  ;;  %v315_v46 = vrot.slane %v314_v42, 4 }
  0x80   : > { %v295_v47 = vadd.f32 %v294_v43, %v293_v39  ;;  %v301_v48 = vrot.slane %v300_v44, 2  ;;  %v316_v49 = vadd.f32 %v315_v46, %v314_v42  ;;  %v310_v50 = vrot.slane %v309_v45, 2 }
  0x82   : > { %v296_v51 = vrot.slane %v295_v47, 1  ;;  %v302_v52 = vadd.f32 %v301_v48, %v300_v44  ;;  %v317_v53 = vrot.slane %v316_v49, 2  ;;  %v311_v56 = vadd.f32 %v310_v50, %v309_v45 }
  0x84   : > { %v297_v54 = vadd.f32 %v296_v51, %v295_v47  ;;  %v303_v55 = vrot.slane %v302_v52, 1  ;;  %v318_v58 = vadd.f32 %v317_v53, %v316_v49  ;;  %v312_v59 = vrot.slane %v311_v56, 1 }
  0x86   : > { %v304_v57 = vadd.f32 %v303_v55, %v302_v52  ;;  %614 = vrcp.f32 %v297_v54  ;;  %v319_v60 = vrot.slane %v318_v58, 1  ;;  %v313_v61 = vadd.f32 %v312_v59, %v311_v56 }
  0x88   : > { %616 = vrcp.f32 %v304_v57  ;;  %v320_v62 = vadd.f32 %v319_v60, %v318_v58 }
  0x90   : > { %v615_v63 = vpop.eup %614 }
  0x91   : > { %v322_v3 = vmul.f32 %v615_v63, %v313_v61 }
  0x92   : > { %v617_v4 = vpop.eup %616 }
  0x93   : > { %v324_v5 = vmul.f32 %v617_v4, %v320_v62  ;;  %v325_v6 = vadd.f32 1e-05, %v322_v3 }
  0x95   : > { %v326_v7 = vadd.f32 1e-05, %v324_v5  ;;  %618 = vlog2.f32 %v325_v6  ;;  %v331_v8 = vsub.f32 1.0, %v325_v6 }
  0x97   : > { %620 = vlog2.f32 %v326_v7  ;;  %v332_v9 = vsub.f32 1.0, %v326_v7  ;;  %v333_v10 = vmul.f32 %v331_v8, %v331_v8 }
  0x99   : > { %v334_v15 = vmul.f32 %v332_v9, %v332_v9 }
  0x9f   : > { %v619_v13 = vpop.eup %618 }
  0xa0   : > { %v328_v14 = vmul.f32 0.6931472, %v619_v13 }
  0xa1   : > { %v621_v16 = vpop.eup %620 }
  0xa2   : > { %v330_v17 = vmul.f32 0.6931472, %v621_v16  ;;  %v335_v18 = vmul.f32 %v333_v10, %v328_v14 }
  0xa4   : > { %v336_v21 = vmul.f32 %v334_v15, %v330_v17  ;;  %v337_v23 = vsub.f32 0.0, %v335_v18 }
  0xa6   : > { %v338_v24 = vsub.f32 0.0, %v336_v21 }
  0xa8   : > { %v342_v27 = vcombine.low %v337_v23, %v338_v24 }
  0xaa   : > { %v349_v28 = vrot.slane %v342_v27, %v348_v26 }
  0xac   : > { %v356_v30 = vrot.slane %v349_v28, %v348_v26 }
  0xae   : > { %v358_v31 = vadd.f32 %v356_v30, %v339_v29 }
  0xb0   : > { %363 = vst.msk [vmem:[#allocation2] sm:$0x3] %vm954_vm0, %v358_v31 }
  0xb7   : > { %v367_v32 = vld [vmem:[#allocation2] sm:$0x3] }
  0xb8   : > { %v372_v33 = vrot.slane %v367_v32, %v253_v22  ;;  %v376_v34 = vrot.slane %v367_v32, %v257_v25 }
  0xba   : > { %v380_v35 = vsel %vm379_vm4, %v372_v33, 0.0  ;;  %v381_v36 = vsel %vm379_vm4, %v376_v34, 0.0 }
  0xbb   : > { %v382_v37 = vadd.f32 %v381_v36, %v380_v35 }
  0xbd   : > { %383 = vadd.xlane.f32.xlu0 %v382_v37 }
 0x14a   : > { %v384_v38 = vpop.xlane.xlu0 %383 }
 0x14b   : > { %v385_v39 = vrot.slane %v384_v38, 4 }
 0x14d   : > { %v386_v1 = vadd.f32 %v385_v39, %v384_v38 }
 0x14f   : > { %v387_v40 = vrot.slane %v386_v1, 2 }
 0x151   : > { %v388_v41 = vadd.f32 %v387_v40, %v386_v1 }
 0x153   : > { %v389_v42 = vrot.slane %v388_v41, 1 }
 0x155   : > { %v390_v22 = vadd.f32 %v389_v42, %v388_v41 }
 0x157   : > { %539 = vpush %v390_v22 }
 0x188   : > { %s540_s20 = spop %539 }
 0x189   : > { %v395_v25 = vstv %s540_s20 }
 0x18a   : > { %v396_v2 = vsel %vm394_vm5, %v395_v25, 0.0 }
 0x18b   : > { %397 = vst [vmem:[%s231_s21] sm:$0x1] %v396_v2 }
 0x18c   : > { %695 = shalt.err (!%p692_p2)
}
 0x18d   : > { %s696_s15 = scalar_lea.hbm %s992_s28, 16  ;;  %s700_s6 = scalar_lea.hbm %s1043_s2, 32 }
 0x18e   : > { %p697_p9 = scmp.ne.s32.totalorder %s992_s28, %s696_s15  ;;  %p701_p6 = scmp.lt.u32.totalorder %s992_s28, %s1043_s2 }
 0x18f   : > { %p702_p13 = scmp.lt.u32.totalorder %s700_s6, %s696_s15  ;;  %p704_p8 = scmp.lt.u32.totalorder %s696_s15, %s992_s28 }
 0x190   : > { %p698_p11 = pnand %p697_p9, %p1058_p0 }
 0x191   : > { %p703_p5 = por %p702_p13, %p701_p6 }
 0x192   : > { %p699_p3 = pneg %p698_p11 }
 0x193   : > { %p705_p7 = por %p704_p8, %p703_p5 }
 0x195   : > { %p706_p4 = pnand %p705_p7, %p699_p3 }
 0x197   : > { %709 = shalt.err (!%p706_p4)
}
 0x198   : > { %545 = dma.vmem_to_hbm [thread:$0]  (%p1058_p0), %s994_s30, 16, %s992_s28, %s399_s25  }
 0x199 PF: > { %s424_s16 = sand.u32 1, %s748_s9   ;;  %p1059_p10 = scmp.ne.s32.totalorder %s1049_s24, 0 }
 0x19a   : > { %p1060_p12 = scmp.ge.s32.totalorder %s768_s14, 2  ;;  %s425_s21 = scalar_lea.sflag [#allocation5], %s424_s16 }
 0x19c   : > { %p555_p1 = pnand %p1060_p12, %p1059_p10 }
 0x19e   : > { %743 = dma.done.wait (!%p555_p1), %s425_s21, 16  }
 0x19f   : > { %745 = vsyncadd (!%p555_p1), %s425_s21, 4294967280  ;;  %s21_s14 = sadd.s32 1, %s768_s14   ;;  %s1061_s9 = smov %s752_s10 }
 0x1a0   : > { %p18_p2 = scmp.ge.s32.totalorder %s21_s14, 4   ;;  %s1062_s10 = smov %s756_s11 }
 0x1a1   : > { %s1063_s11 = smov %s847_s23  ;;  %s1064_s12 = smov %s764_s13 }
 0x1a2   : > { %s1065_s13 = smov %s1067_s17  ;;  %20 = sbr.rel (!%p18_p2) target bundleno = 8 (0x8), region = 94 }
 0x1a9   :  { %429 = vsyncpa [#allocation4], 1 }
 0x1aa   :  { %431 = vsyncpa [#allocation4 + $0x1], 1 }
 0x1ab   :  { %432 = vsyncpa [#allocation7], 1 }
 0x1ac   :  { %434 = vsyncpa [#allocation7 + $0x1], 1 }
 0x1ad   :  { %435 = vsyncpa [#allocation5], 1 }
 0x1ae   :  { %437 = vsyncpa [#allocation5 + $0x1], 1 }

</bundles_post_ra>
